<compile_context>
chip_gen: v7x
topology: tpu7x:2x2x1
jax: 0.10.0
libtpu: 0.0.40
codegen_flags: <defaults>
</compile_context>

<pallas_src>
import numpy as np
import jax
import jax.numpy as jnp
from jax.experimental import pallas as pl
from jax.experimental.pallas import tpu as pltpu

CIN = 3
COUT = 3
COUTP = 4                    # pad channels 3 -> 4 so lane dims are 128-multiples
K = 5
STRIDE = 2
PAD = 2
H_IN = 16
W_IN = 16
H_OUT = (H_IN - 1) * STRIDE - 2 * PAD + K   # 31
W_OUT = (W_IN - 1) * STRIDE - 2 * PAD + K   # 31
H_RS = 64
W_RS = 64
XCOLS = CIN * W_IN           # 48   : (ci, iw) columns of the input slab
OCOLS = COUTP * W_RS         # 256  : (co4, ow64) columns
TCOLS = K * OCOLS            # 1280 : (kh, co4, ow64) columns


def _fused_deconv_sigmoid_resize_kernel(x_ref, b_ref, s_ref, bias_ref, o_ref):
    """One grid step = one block of BB batch elements (all channels fused).

    x_ref    : VMEM f32[BB, 16, 48]        input slab; cols = (ci, iw)
    b_ref    : VMEM f32[48, 1280]          band matrix; cols = (kh, co4, ow64)
    s_ref    : VMEM f32[5, BB*64, BB*16]   0/1 block-diag selection (H deconv + H resize)
    bias_ref : VMEM f32[1, 256]            bias broadcast over (co4, ow64) cols
    o_ref    : VMEM f32[BB, 64, 256]       lane-dense output slab
    """
    bb = x_ref.shape[0]
    xm = x_ref[...].reshape(bb * H_IN, XCOLS)             # (BB*16, 48)

    # ---- stage 1 (MXU): contract (ci, iw); applies W-deconv + W-resize ------
    t = jnp.dot(xm, b_ref[...], preferred_element_type=jnp.float32)
    # t: (BB*16, 1280), columns = (kh, co4, ow64)

    # ---- stage 2 (MXU): contract (ih, kh); applies H-deconv + H-resize ------
    acc = jnp.dot(s_ref[0], t[:, :OCOLS], preferred_element_type=jnp.float32)
    for kh in range(1, K):
        acc = acc + jnp.dot(s_ref[kh], t[:, kh * OCOLS:(kh + 1) * OCOLS],
                            preferred_element_type=jnp.float32)
    # acc: (BB*64, 256) pre-activation

    acc = acc + bias_ref[...]                             # (1,256) sublane broadcast
    o_ref[...] = jax.nn.sigmoid(acc).reshape(o_ref.shape)  # EUP, lane-dense store


def _pick_block_batch(n):
    """Batch elements per grid step: amortize per-step overhead for big n,
    but keep >=2 grid steps when n >= 2 so v7x megacore gets a 2-way split."""
    if n <= 3:
        return 1
    return max(1, min(8, n // 2))


def net_forward(x, weight, bias):
    """x: (N,3,16,16) f32. weight: (3,3,5,5) PyTorch ConvTranspose2d layout
    (in, out, kH, kW). bias: (3,)."""
    n = x.shape[0]
    x = x.astype(jnp.float32)
    weight = weight.astype(jnp.float32)
    bias = bias.astype(jnp.float32)

    bb = _pick_block_batch(n)
    n_pad = -(-n // bb) * bb

    # ---- static index maps (numpy, trace-time constants) -------------------
    # PyTorch F.interpolate default mode='nearest': src = floor(dst * in / out).
    idx_h = (np.arange(H_RS) * H_OUT) // H_RS             # (64,)
    idx_w = (np.arange(W_RS) * W_OUT) // W_RS             # (64,)

    # Transposed-conv relation along W: src_col = 2*iw - PAD + kw.
    kw_idx = idx_w[None, :] - STRIDE * np.arange(W_IN)[:, None] + PAD   # (16, 64)
    valid_w = (kw_idx >= 0) & (kw_idx < K)
    kw_clip = np.clip(kw_idx, 0, K - 1)

    # 0/1 selection matrices: S[kh, oh64, ih] = 1 iff idx_h[oh64] == 2*ih - PAD + kh.
    S = np.zeros((K, H_RS, H_IN), np.float32)
    for kh in range(K):
        num = idx_h + PAD - kh
        ih = num // 2
        ok = (num % 2 == 0) & (ih >= 0) & (ih < H_IN)
        S[kh, np.arange(H_RS)[ok], ih[ok]] = 1.0
    # Block-diagonal over the batch block (BB=1 -> S itself).
    S_blk = np.zeros((K, bb * H_RS, bb * H_IN), np.float32)
    for b in range(bb):
        S_blk[:, b * H_RS:(b + 1) * H_RS, b * H_IN:(b + 1) * H_IN] = S
    S_blk = jnp.asarray(S_blk)                            # (5, BB*64, BB*16)

    # ---- weight-dependent band matrix (tiny wrapper glue) -------------------
    # Bcat[ci*16+iw, (kh, co4, ow64)] = weight[ci, co, kh, idx_w[ow]-2*iw+PAD] (0 if invalid)
    wp = jnp.pad(weight, ((0, 0), (0, COUTP - COUT), (0, 0), (0, 0)))    # (3,4,5,5)
    Bg = wp[:, :, :, kw_clip]                             # (ci, co4, kh, iw, ow64)
    Bg = Bg * jnp.asarray(valid_w, jnp.float32)[None, None, None, :, :]
    Bcat = Bg.transpose(0, 3, 2, 1, 4).reshape(XCOLS, TCOLS)             # (48, 1280)

    bias_cols = jnp.repeat(jnp.pad(bias, (0, COUTP - COUT)), W_RS)[None, :]  # (1,256)

    # Input slab: rows = ih, cols = (ci, iw)  (layout plumbing in the wrapper).
    x_t = x.transpose(0, 2, 1, 3).reshape(n, H_IN, XCOLS)                # (n,16,48)
    if n_pad != n:
        x_t = jnp.pad(x_t, ((0, n_pad - n), (0, 0), (0, 0)))

    raw = pl.pallas_call(
        _fused_deconv_sigmoid_resize_kernel,
        out_shape=jax.ShapeDtypeStruct((n_pad, H_RS, OCOLS), jnp.float32),
        grid=(n_pad // bb,),
        in_specs=[
            pl.BlockSpec((bb, H_IN, XCOLS), lambda g: (g, 0, 0)),         # x slab
            pl.BlockSpec((XCOLS, TCOLS), lambda g: (0, 0)),               # Bcat (resident)
            pl.BlockSpec((K, bb * H_RS, bb * H_IN), lambda g: (0, 0, 0)),  # S (resident)
            pl.BlockSpec((1, OCOLS), lambda g: (0, 0)),                   # bias cols
        ],
        out_specs=pl.BlockSpec((bb, H_RS, OCOLS), lambda g: (g, 0, 0)),
        compiler_params=pltpu.CompilerParams(
            dimension_semantics=("parallel",)),            # megacore split over batch blocks
    )(x_t, Bcat, S_blk, bias_cols)

    # (n, 64, 256) slab with columns (co4, ow) -> NCHW (n, 3, 64, 64).
    out = raw[:n, :, :COUT * W_RS].reshape(n, H_RS, COUT, W_RS).transpose(0, 2, 1, 3)
    return out


def _reference(x, weight, bias):
    """Pure-JAX reference (lhs-dilated conv == ConvTranspose2d, then resize)."""
    w_eff = jnp.flip(weight, axis=(2, 3)).transpose(1, 0, 2, 3)  # (COUT, CIN, 5, 5)
    conv = jax.lax.conv_general_dilated(
        x, w_eff, window_strides=(1, 1),
        padding=((K - 1 - PAD, K - 1 - PAD), (K - 1 - PAD, K - 1 - PAD)),
        lhs_dilation=(STRIDE, STRIDE), rhs_dilation=(1, 1),
        dimension_numbers=('NCHW', 'OIHW', 'NCHW'))
    conv = conv + bias[None, :, None, None]
    y = jax.nn.sigmoid(conv)                               # (N, 3, 31, 31)
    idx_h = (np.arange(H_RS) * H_OUT) // H_RS
    idx_w = (np.arange(W_RS) * W_OUT) // W_RS
    return y[:, :, idx_h, :][:, :, :, idx_w]


if __name__ == "__main__":
    key = jax.random.PRNGKey(0)
    k_x, k_w, k_b = jax.random.split(key, 3)

    batch = 2
    x = jax.random.normal(k_x, (batch, CIN, H_IN, W_IN), dtype=jnp.float32)

    # Deterministic params (PyTorch ConvTranspose2d layout: (in, out, kH, kW)).
    fan = CIN * K * K
    bound = 1.0 / np.sqrt(fan)
    weight = jax.random.uniform(k_w, (CIN, COUT, K, K), dtype=jnp.float32,
                                minval=-bound, maxval=bound)
    bias = jax.random.uniform(k_b, (COUT,), dtype=jnp.float32,
                              minval=-bound, maxval=bound)

    fwd = jax.jit(net_forward)
    out = jax.block_until_ready(fwd(x, weight, bias))
    ref = jax.block_until_ready(_reference(x, weight, bias))

    assert out.shape == (batch, COUT, H_RS, W_RS), out.shape
    if not np.allclose(np.asarray(out), np.asarray(ref), atol=2e-4, rtol=2e-4):
        raise AssertionError("Pallas kernel output does not match reference")

    print("KERNEL_OK")
</pallas_src>

<mosaic_0001>
module attributes {stable_mosaic.version = 11 : i64} {
  func.func @_fused_deconv_sigmoid_resize_kernel(%arg0: i32, %arg1: memref<1x16x48xf32, #tpu.memory_space<vmem>>, %arg2: memref<48x1280xf32, #tpu.memory_space<vmem>>, %arg3: memref<5x64x16xf32, #tpu.memory_space<vmem>>, %arg4: memref<1x256xf32, #tpu.memory_space<vmem>>, %arg5: memref<1x64x256xf32, #tpu.memory_space<vmem>>) attributes {dimension_semantics = [#tpu.dimension_semantics<parallel>], iteration_bounds = array<i64: 2>, scalar_prefetch = 0 : i64, scratch_operands = 0 : i64, tpu.core_type = #tpu.core_type<tc>, window_params = [{transform_indices = @transform_0, window_bounds = array<i64: 1, 16, 48>}, {pipeline_mode = #tpu.pipeline_mode<synchronous>, transform_indices = @transform_1, window_bounds = array<i64: 48, 1280>}, {pipeline_mode = #tpu.pipeline_mode<synchronous>, transform_indices = @transform_2, window_bounds = array<i64: 5, 64, 16>}, {pipeline_mode = #tpu.pipeline_mode<synchronous>, transform_indices = @transform_3, window_bounds = array<i64: 1, 256>}, {transform_indices = @transform_4, window_bounds = array<i64: 1, 64, 256>}]} {
    %c0 = arith.constant 0 : index
    %c0_0 = arith.constant 0 : index
    %c0_1 = arith.constant 0 : index
    %0 = vector.load %arg1[%c0, %c0_0, %c0_1] : memref<1x16x48xf32, #tpu.memory_space<vmem>>, vector<1x16x48xf32>
    %1 = vector.shape_cast %0 : vector<1x16x48xf32> to vector<16x48xf32>
    %c0_2 = arith.constant 0 : index
    %c0_3 = arith.constant 0 : index
    %2 = vector.load %arg2[%c0_2, %c0_3] : memref<48x1280xf32, #tpu.memory_space<vmem>>, vector<48x1280xf32>
    %cst = arith.constant dense<0.000000e+00> : vector<16x1280xf32>
    %3 = tpu.matmul %1, %2, %cst {dimension_numbers = #tpu.dot_dimension_numbers<[1], [0], [0], [1], [0, 0, 1, 1], [], []>} : vector<16x48xf32>, vector<48x1280xf32>, vector<16x1280xf32> -> vector<16x1280xf32>
    %c0_4 = arith.constant 0 : index
    %c0_5 = arith.constant 0 : index
    %c0_6 = arith.constant 0 : index
    %4 = vector.load %arg3[%c0_4, %c0_5, %c0_6] : memref<5x64x16xf32, #tpu.memory_space<vmem>>, vector<1x64x16xf32>
    %5 = vector.shape_cast %4 : vector<1x64x16xf32> to vector<64x16xf32>
    %6 = vector.extract_strided_slice %3 {offsets = [0, 0], sizes = [16, 256], strides = [1, 1]} : vector<16x1280xf32> to vector<16x256xf32>
    %cst_7 = arith.constant dense<0.000000e+00> : vector<64x256xf32>
    %7 = tpu.matmul %5, %6, %cst_7 {dimension_numbers = #tpu.dot_dimension_numbers<[1], [0], [0], [1], [0, 0, 1, 1], [], []>} : vector<64x16xf32>, vector<16x256xf32>, vector<64x256xf32> -> vector<64x256xf32>
    %c1 = arith.constant 1 : index
    %c0_8 = arith.constant 0 : index
    %c0_9 = arith.constant 0 : index
    %8 = vector.load %arg3[%c1, %c0_8, %c0_9] : memref<5x64x16xf32, #tpu.memory_space<vmem>>, vector<1x64x16xf32>
    %9 = vector.shape_cast %8 : vector<1x64x16xf32> to vector<64x16xf32>
    %10 = vector.extract_strided_slice %3 {offsets = [0, 256], sizes = [16, 256], strides = [1, 1]} : vector<16x1280xf32> to vector<16x256xf32>
    %cst_10 = arith.constant dense<0.000000e+00> : vector<64x256xf32>
    %11 = tpu.matmul %9, %10, %cst_10 {dimension_numbers = #tpu.dot_dimension_numbers<[1], [0], [0], [1], [0, 0, 1, 1], [], []>} : vector<64x16xf32>, vector<16x256xf32>, vector<64x256xf32> -> vector<64x256xf32>
    %12 = arith.addf %7, %11 : vector<64x256xf32>
    %c2 = arith.constant 2 : index
    %c0_11 = arith.constant 0 : index
    %c0_12 = arith.constant 0 : index
    %13 = vector.load %arg3[%c2, %c0_11, %c0_12] : memref<5x64x16xf32, #tpu.memory_space<vmem>>, vector<1x64x16xf32>
    %14 = vector.shape_cast %13 : vector<1x64x16xf32> to vector<64x16xf32>
    %15 = vector.extract_strided_slice %3 {offsets = [0, 512], sizes = [16, 256], strides = [1, 1]} : vector<16x1280xf32> to vector<16x256xf32>
    %cst_13 = arith.constant dense<0.000000e+00> : vector<64x256xf32>
    %16 = tpu.matmul %14, %15, %cst_13 {dimension_numbers = #tpu.dot_dimension_numbers<[1], [0], [0], [1], [0, 0, 1, 1], [], []>} : vector<64x16xf32>, vector<16x256xf32>, vector<64x256xf32> -> vector<64x256xf32>
    %17 = arith.addf %12, %16 : vector<64x256xf32>
    %c3 = arith.constant 3 : index
    %c0_14 = arith.constant 0 : index
    %c0_15 = arith.constant 0 : index
    %18 = vector.load %arg3[%c3, %c0_14, %c0_15] : memref<5x64x16xf32, #tpu.memory_space<vmem>>, vector<1x64x16xf32>
    %19 = vector.shape_cast %18 : vector<1x64x16xf32> to vector<64x16xf32>
    %20 = vector.extract_strided_slice %3 {offsets = [0, 768], sizes = [16, 256], strides = [1, 1]} : vector<16x1280xf32> to vector<16x256xf32>
    %cst_16 = arith.constant dense<0.000000e+00> : vector<64x256xf32>
    %21 = tpu.matmul %19, %20, %cst_16 {dimension_numbers = #tpu.dot_dimension_numbers<[1], [0], [0], [1], [0, 0, 1, 1], [], []>} : vector<64x16xf32>, vector<16x256xf32>, vector<64x256xf32> -> vector<64x256xf32>
    %22 = arith.addf %17, %21 : vector<64x256xf32>
    %c4 = arith.constant 4 : index
    %c0_17 = arith.constant 0 : index
    %c0_18 = arith.constant 0 : index
    %23 = vector.load %arg3[%c4, %c0_17, %c0_18] : memref<5x64x16xf32, #tpu.memory_space<vmem>>, vector<1x64x16xf32>
    %24 = vector.shape_cast %23 : vector<1x64x16xf32> to vector<64x16xf32>
    %25 = vector.extract_strided_slice %3 {offsets = [0, 1024], sizes = [16, 256], strides = [1, 1]} : vector<16x1280xf32> to vector<16x256xf32>
    %cst_19 = arith.constant dense<0.000000e+00> : vector<64x256xf32>
    %26 = tpu.matmul %24, %25, %cst_19 {dimension_numbers = #tpu.dot_dimension_numbers<[1], [0], [0], [1], [0, 0, 1, 1], [], []>} : vector<64x16xf32>, vector<16x256xf32>, vector<64x256xf32> -> vector<64x256xf32>
    %27 = arith.addf %22, %26 : vector<64x256xf32>
    %c0_20 = arith.constant 0 : index
    %c0_21 = arith.constant 0 : index
    %28 = vector.load %arg4[%c0_20, %c0_21] : memref<1x256xf32, #tpu.memory_space<vmem>>, vector<1x256xf32>
    %29 = vector.broadcast %28 : vector<1x256xf32> to vector<64x256xf32>
    %30 = arith.addf %27, %29 : vector<64x256xf32>
    %31 = arith.negf %30 : vector<64x256xf32>
    %32 = math.exp %31 : vector<64x256xf32>
    %cst_22 = arith.constant 1.000000e+00 : f32
    %33 = vector.broadcast %cst_22 : f32 to vector<64x256xf32>
    %34 = arith.addf %33, %32 : vector<64x256xf32>
    %35 = arith.divf %33, %34 : vector<64x256xf32>
    %36 = vector.shape_cast %35 : vector<64x256xf32> to vector<1x64x256xf32>
    %c0_23 = arith.constant 0 : index
    %c0_24 = arith.constant 0 : index
    %c0_25 = arith.constant 0 : index
    %37 = vector.load %arg5[%c0_23, %c0_24, %c0_25] : memref<1x64x256xf32, #tpu.memory_space<vmem>>, vector<1x64x256xf32>
    tpu.vector_store %arg5[%c0_23, %c0_24, %c0_25], %36 {strides = array<i32>} : memref<1x64x256xf32, #tpu.memory_space<vmem>>, vector<1x64x256xf32>,
    return
  }
  func.func @transform_0(%arg0: i32) -> (i32, i32, i32) {
    %c0_i32 = arith.constant 0 : i32
    %c0_i32_0 = arith.constant 0 : i32
    %c0_i32_1 = arith.constant 0 : i32
    return %arg0, %c0_i32, %c0_i32_0 : i32, i32, i32
  }
  func.func @transform_1(%arg0: i32) -> (i32, i32) {
    %c0_i32 = arith.constant 0 : i32
    %c0_i32_0 = arith.constant 0 : i32
    %c0_i32_1 = arith.constant 0 : i32
    return %c0_i32, %c0_i32_0 : i32, i32
  }
  func.func @transform_2(%arg0: i32) -> (i32, i32, i32) {
    %c0_i32 = arith.constant 0 : i32
    %c0_i32_0 = arith.constant 0 : i32
    %c0_i32_1 = arith.constant 0 : i32
    %c0_i32_2 = arith.constant 0 : i32
    return %c0_i32, %c0_i32_0, %c0_i32_1 : i32, i32, i32
  }
  func.func @transform_3(%arg0: i32) -> (i32, i32) {
    %c0_i32 = arith.constant 0 : i32
    %c0_i32_0 = arith.constant 0 : i32
    %c0_i32_1 = arith.constant 0 : i32
    return %c0_i32, %c0_i32_0 : i32, i32
  }
  func.func @transform_4(%arg0: i32) -> (i32, i32, i32) {
    %c0_i32 = arith.constant 0 : i32
    %c0_i32_0 = arith.constant 0 : i32
    %c0_i32_1 = arith.constant 0 : i32
    return %arg0, %c0_i32, %c0_i32_0 : i32, i32, i32
  }
}

</mosaic_0001>

<bundles_post_ra>
// kernel: net_forward.1
= control target key start
LH: loop header
LB: loop body
LE: loop exit
PB: predicated region body
PF: predicated region fallthrough
CT: control target
= control target key end

     0   :  { %s1987_s15 = smov 0   ;;  %s2485_s0 = inlined_call_operand.vmem [shape: f32[2,16,48], index: 0, kind: input, shape index: {}]   ;;  %s2486_s1 = inlined_call_operand.vmem [shape: f32[48,1280], index: 1, kind: input, shape index: {}]   ;;  %s2487_s2 = inlined_call_operand.vmem [shape: f32[5,64,16], index: 2, kind: input, shape index: {}]   ;;  %s2488_s3 = inlined_call_operand.vmem [shape: f32[1,256], index: 3, kind: input, shape index: {}]   ;;  %s2489_s4 = inlined_call_operand.vmem [shape: f32[2,64,256], index: 4, kind: output, shape index: {}]  }
   0x1 LB: > { %s1625_s16 = sadd.s32 4294967295, %s1959_s15   ;;  %p1629_p0 = scmp.ge.s32.totalorder %s1959_s15, 1  ;;  %s1959_s15 = sphi %s1987_s15, %s14_s15  }
   0x2   : > { %p162_p1 = scmp.lt.s32.totalorder %s1959_s15, 3 }
   0x4   : > { %p163_p2 = pnand %p1629_p0, %p162_p1 }
   0x5   : > { %v201_v0 = vld [vmem:[%s2486_s1 + $0x8] sm:$0xff] (!%p163_p2)  ;;  %v211_v1 = vld [vmem:[%s2486_s1 + $0x58] sm:$0xff] (!%p163_p2)  ;;  %v200_v2 = vld [vmem:[%s2486_s1] sm:$0xff] (!%p163_p2)  ;;  %p188_p3 = scmp.lt.s32.totalorder (!%p163_p2), %s1625_s16, 1  ;;  %v1961_v7 = vmov (!%p163_p2), 0.0   ;;  %vm260_vm0 = vcmask (!%p163_p2), 392192  }
   0x6   : > { %166 = sbr.rel (%p163_p2) target bundleno = 605 (0x25d), region = 36  ;;  %v1736_v3 = vpack.c.bf16 (!%p163_p2), %v211_v1, %v201_v0  ;;  %v210_v4 = vld [vmem:[%s2486_s1 + $0x50] sm:$0xff] (!%p163_p2)  ;;  %v221_v5 = vld [vmem:[%s2486_s1 + $0xa8] sm:$0xff] (!%p163_p2)  ;;  %v231_v6 = vld [vmem:[%s2486_s1 + $0xf8] sm:$0xff] (!%p163_p2)  ;;  %331 = vmatprep.mubr.f32.mxu0 (!%p163_p2), %v1961_v7  ;;  %562 = vmatprep.mubr.f32.mxu1 (!%p163_p2), %v1961_v7  ;;  %vm669_vm1 = vcmask (!%p163_p2), 130048  }
   0x7   : > { %v1738_v8 = vpack.c.bf16 (!%p163_p2), %v210_v4, %v200_v2  ;;  %v1740_v9 = vpack.c.bf16 (!%p163_p2), %v231_v6, %v221_v5  ;;  %v220_v10 = vld [vmem:[%s2486_s1 + $0xa0] sm:$0xff] (!%p163_p2)  ;;  %v230_v11 = vld [vmem:[%s2486_s1 + $0xf0] sm:$0xff] (!%p163_p2)  ;;  %v241_v12 = vld [vmem:[%s2486_s1 + $0x148] sm:$0xff] (!%p163_p2) }
   0x8   : > { %1737 = vmatprep.subr.bf16.mxu0 (!%p163_p2), %v1736_v3  ;;  %v251_v13 = vld [vmem:[%s2486_s1 + $0x198] sm:$0xff] (!%p163_p2)  ;;  %v1742_v14 = vpack.c.bf16 (!%p163_p2), %v230_v11, %v220_v10  ;;  %v240_v16 = vld [vmem:[%s2486_s1 + $0x140] sm:$0xff] (!%p163_p2)  ;;  %v250_v17 = vld [vmem:[%s2486_s1 + $0x190] sm:$0xff] (!%p163_p2) }
   0x9   : > { %1739 = vmatpush1.bf16.msra.mxu0 (!%p163_p2), %v1738_v8  ;;  %v1744_v15 = vpack.c.bf16 (!%p163_p2), %v251_v13, %v241_v12  ;;  %v203_v18 = vld [vmem:[%s2486_s1 + $0x18] sm:$0xff] (!%p163_p2)  ;;  %v213_v19 = vld [vmem:[%s2486_s1 + $0x68] sm:$0xff] (!%p163_p2)  ;;  %v1746_v20 = vpack.c.bf16 (!%p163_p2), %v250_v17, %v240_v16  ;;  %v202_v22 = vld [vmem:[%s2486_s1 + $0x10] sm:$0xff] (!%p163_p2) }
   0xa   : > { %1741 = vmatprep.subr.bf16.mxu0 (!%p163_p2), %v1740_v9  ;;  %v1748_v21 = vpack.c.bf16 (!%p163_p2), %v213_v19, %v203_v18  ;;  %v212_v23 = vld [vmem:[%s2486_s1 + $0x60] sm:$0xff] (!%p163_p2)  ;;  %v223_v24 = vld [vmem:[%s2486_s1 + $0xb8] sm:$0xff] (!%p163_p2)  ;;  %v233_v25 = vld [vmem:[%s2486_s1 + $0x108] sm:$0xff] (!%p163_p2) }
   0xb   : > { %v207_v26 = vld [vmem:[%s2486_s1 + $0x38] sm:$0xff] (!%p163_p2)  ;;  %v217_v27 = vld [vmem:[%s2486_s1 + $0x88] sm:$0xff] (!%p163_p2)  ;;  %v206_v29 = vld [vmem:[%s2486_s1 + $0x30] sm:$0xff] (!%p163_p2)  ;;  %v1750_v32 = vpack.c.bf16 (!%p163_p2), %v212_v23, %v202_v22  ;;  %v1752_v36 = vpack.c.bf16 (!%p163_p2), %v233_v25, %v223_v24 }
   0xc   : > { %v1772_v28 = vpack.c.bf16 (!%p163_p2), %v217_v27, %v207_v26  ;;  %v216_v30 = vld [vmem:[%s2486_s1 + $0x80] sm:$0xff] (!%p163_p2)  ;;  %v222_v33 = vld [vmem:[%s2486_s1 + $0xb0] sm:$0xff] (!%p163_p2)  ;;  %v227_v35 = vld [vmem:[%s2486_s1 + $0xd8] sm:$0xff] (!%p163_p2) }
   0xd   : > { %s2491_s16 = smov (!%p188_p3, %s1625_s16), 1  ;;  %1743 = vmatpush1.bf16.msra.mxu0 %v1742_v14  ;;  %v1774_v34 = vpack.c.bf16 %v216_v30, %v206_v29  ;;  %v232_v37 = vld [vmem:[%s2486_s1 + $0x100] sm:$0xff]  ;;  %v243_v38 = vld [vmem:[%s2486_s1 + $0x158] sm:$0xff]  ;;  %v237_v39 = vld [vmem:[%s2486_s1 + $0x128] sm:$0xff] }
   0xe   : > { %s1734_s17 = sshll.u32 %s2491_s16, 4  ;;  %1745 = vmatprep.subr.bf16.mxu0 %v1744_v15  ;;  %1773 = vmatprep.subr.bf16.mxu1 %v1772_v28  ;;  %v253_v40 = vld [vmem:[%s2486_s1 + $0x1a8] sm:$0xff]  ;;  %v1776_v41 = vpack.c.bf16 %v237_v39, %v227_v35  ;;  %v226_v42 = vld [vmem:[%s2486_s1 + $0xd0] sm:$0xff]  ;;  %v236_v43 = vld [vmem:[%s2486_s1 + $0x120] sm:$0xff]  ;;  %v1754_v48 = vpack.c.bf16 %v232_v37, %v222_v33  ;;  %s1735_s6 = sshll.u32 %s2491_s16, 7 }
   0xf   : > { %s2045_s24 = scalar_lea.vmem %s2485_s0, %s1734_s17  ;;  %1775 = vmatpush1.bf16.msra.mxu1 %v1774_v34  ;;  %v1778_v44 = vpack.c.bf16 %v236_v43, %v226_v42  ;;  %v247_v45 = vld [vmem:[%s2486_s1 + $0x178] sm:$0xff]  ;;  %v257_v46 = vld [vmem:[%s2486_s1 + $0x1c8] sm:$0xff]  ;;  %v246_v50 = vld [vmem:[%s2486_s1 + $0x170] sm:$0xff]  ;;  %v1756_v52 = vpack.c.bf16 %v253_v40, %v243_v38  ;;  %s2459_s9 = scalar_lea.vmem %s2489_s4, %s1735_s6 }
  0x10   : > { %v2072_v31 = vld [vmem:[%s2045_s24] sm:$0xff]  ;;  %v2108_v47 = vld [vmem:[%s2045_s24 + $0x8] sm:$0xff]  ;;  %v1780_v49 = vpack.c.bf16 %v257_v46, %v247_v45  ;;  %v242_v53 = vld [vmem:[%s2486_s1 + $0x150] sm:$0xff]  ;;  %1777 = vmatprep.subr.bf16.mxu1 %v1776_v41 }
  0x11   : > { %1747 = vmatpush1.bf16.msra.mxu0 %v1746_v20  ;;  %v256_v51 = vld [vmem:[%s2486_s1 + $0x1c0] sm:$0xff]  ;;  %v205_v55 = vld [vmem:[%s2486_s1 + $0x28] sm:$0xff]  ;;  %v215_v56 = vld [vmem:[%s2486_s1 + $0x78] sm:$0xff] }
  0x12   : > { %1749 = vmatprep.subr.bf16.mxu0 %v1748_v21  ;;  %v252_v54 = vld [vmem:[%s2486_s1 + $0x1a0] sm:$0xff]  ;;  %v1782_v57 = vpack.c.bf16 %v256_v51, %v246_v50  ;;  %v1760_v59 = vpack.c.bf16 %v215_v56, %v205_v55  ;;  %v214_v61 = vld [vmem:[%s2486_s1 + $0x70] sm:$0xff]  ;;  %v225_v62 = vld [vmem:[%s2486_s1 + $0xc8] sm:$0xff] }
  0x13   : > { %1779 = vmatpush1.bf16.msra.mxu1 %v1778_v44  ;;  %v1758_v58 = vpack.c.bf16 %v252_v54, %v242_v53  ;;  %v204_v60 = vld [vmem:[%s2486_s1 + $0x20] sm:$0xff]  ;;  %v235_v63 = vld [vmem:[%s2486_s1 + $0x118] sm:$0xff]  ;;  %v234_v3 = vld [vmem:[%s2486_s1 + $0x110] sm:$0xff] }
  0x14   : > { %1634 = vmatmul.mubr.msk.f32.vlgmr.msra.gmra.mrb[0].mxu0 %vm260_vm0, %v2072_v31  ;;  %1781 = vmatprep.subr.bf16.mxu1 %v1780_v49  ;;  %v1762_v0 = vpack.c.bf16 %v214_v61, %v204_v60  ;;  %v1764_v1 = vpack.c.bf16 %v235_v63, %v225_v62  ;;  %v224_v2 = vld [vmem:[%s2486_s1 + $0xc0] sm:$0xff]  ;;  %v245_v4 = vld [vmem:[%s2486_s1 + $0x168] sm:$0xff]  ;;  %v255_v5 = vld [vmem:[%s2486_s1 + $0x1b8] sm:$0xff] }
  0x15   : > { %1751 = vmatpush1.bf16.msra.mxu0 %v1750_v32  ;;  %337 = vmatprep.mubr.f32.mxu0 %v1961_v7  ;;  %v1766_v6 = vpack.c.bf16 %v234_v3, %v224_v2  ;;  %v1768_v8 = vpack.c.bf16 %v255_v5, %v245_v4  ;;  %v244_v9 = vld [vmem:[%s2486_s1 + $0x160] sm:$0xff]  ;;  %v254_v10 = vld [vmem:[%s2486_s1 + $0x1b0] sm:$0xff]  ;;  %v209_v11 = vld [vmem:[%s2486_s1 + $0x48] sm:$0xff] }
  0x16   : > { %1753 = vmatprep.subr.bf16.mxu0 %v1752_v36  ;;  %v219_v12 = vld [vmem:[%s2486_s1 + $0x98] sm:$0xff]  ;;  %v1770_v13 = vpack.c.bf16 %v254_v10, %v244_v9  ;;  %v208_v15 = vld [vmem:[%s2486_s1 + $0x40] sm:$0xff]  ;;  %v218_v16 = vld [vmem:[%s2486_s1 + $0x90] sm:$0xff] }
  0x17   : > { %1783 = vmatpush1.bf16.msra.mxu1 %v1782_v57  ;;  %v1784_v14 = vpack.c.bf16 %v219_v12, %v209_v11  ;;  %v229_v17 = vld [vmem:[%s2486_s1 + $0xe8] sm:$0xff]  ;;  %v239_v18 = vld [vmem:[%s2486_s1 + $0x138] sm:$0xff]  ;;  %v1786_v19 = vpack.c.bf16 %v218_v16, %v208_v15  ;;  %v228_v21 = vld [vmem:[%s2486_s1 + $0xe0] sm:$0xff] }
  0x18   : > { %1635 = vmatmul.mubr.msk.f32.gmra.mrb[2].mxu0 %vm260_vm0, %v2108_v47  ;;  %v1788_v20 = vpack.c.bf16 %v239_v18, %v229_v17  ;;  %v238_v22 = vld [vmem:[%s2486_s1 + $0x130] sm:$0xff]  ;;  %v249_v23 = vld [vmem:[%s2486_s1 + $0x188] sm:$0xff]  ;;  %v259_v24 = vld [vmem:[%s2486_s1 + $0x1d8] sm:$0xff] }
  0x19   : > { %1755 = vmatpush1.bf16.msra.mxu0 %v1754_v48  ;;  %408 = vmatprep.mubr.f32.mxu0 %v1961_v7  ;;  %v1790_v25 = vpack.c.bf16 %v238_v22, %v228_v21  ;;  %v1792_v26 = vpack.c.bf16 %v259_v24, %v249_v23  ;;  %v248_v27 = vld [vmem:[%s2486_s1 + $0x180] sm:$0xff]  ;;  %v258_v28 = vld [vmem:[%s2486_s1 + $0x1d0] sm:$0xff]  ;;  %v1645_v51 = vld [vmem:[%s2487_s2 + $0x48] sm:$0xff] }
  0x1a   : > { %1757 = vmatprep.subr.bf16.mxu0 %v1756_v52  ;;  %1640 = vmatmul.mubr.msk.f32.vlgmr.msra.gmra.mrb[0].mxu1 %vm260_vm0, %v2072_v31  ;;  %v1794_v29 = vpack.c.bf16 %v258_v28, %v248_v27  ;;  %v1644_v48 = vld [vmem:[%s2487_s2 + $0x40] sm:$0xff]  ;;  %v1646_v55 = vld [vmem:[%s2487_s2 + $0x50] sm:$0xff]  ;;  %v1669_v60 = vld [vmem:[%s2487_s2 + $0x88] sm:$0xff] }
  0x1b   : > { %568 = vmatprep.mubr.f32.mxu1 %v1961_v7  ;;  %v1668_v57 = vld [vmem:[%s2487_s2 + $0x80] sm:$0xff]  ;;  %v1671_v5 = vld [vmem:[%s2487_s2 + $0x98] sm:$0xff]  ;;  %v1673_v10 = vld [vmem:[%s2487_s2 + $0xa8] sm:$0xff] }
  0x1c   : > { %v1648_v61 = vld [vmem:[%s2487_s2 + $0x60] sm:$0xff]  ;;  %v1651_v9 = vld [vmem:[%s2487_s2 + $0x78] sm:$0xff]  ;;  %v1674_v12 = vld [vmem:[%s2487_s2 + $0xb0] sm:$0xff] }
  0x1d   : > { %1759 = vmatpush1.bf16.msra.mxu0 %v1758_v58  ;;  %v1647_v58 = vld [vmem:[%s2487_s2 + $0x58] sm:$0xff]  ;;  %v652_v11 = vld [vmem:[%s2487_s2] sm:$0xff]  ;;  %v654_v15 = vld [vmem:[%s2487_s2 + $0x10] sm:$0xff] }
  0x1e   : > { %1761 = vmatprep.subr.bf16.mxu0 %v1760_v59  ;;  %1641 = vmatmul.mubr.msk.f32.gmra.mrb[2].mxu1 %vm260_vm0, %v2108_v47  ;;  %v1684_v16 = vld [vmem:[%s2487_s2 + $0xc0] sm:$0xff]  ;;  %v655_v17 = vld [vmem:[%s2487_s2 + $0x18] sm:$0xff]  ;;  %v1685_v18 = vld [vmem:[%s2487_s2 + $0xc8] sm:$0xff] }
  0x1f   : > { %1041 = vmatprep.mubr.f32.mxu1 %v1961_v7  ;;  %v657_v21 = vld [vmem:[%s2487_s2 + $0x28] sm:$0xff]  ;;  %v1687_v22 = vld [vmem:[%s2487_s2 + $0xd8] sm:$0xff]  ;;  %v658_v23 = vld [vmem:[%s2487_s2 + $0x30] sm:$0xff] }
  0x20   : > { %1636 = vmatmul.mubr.msk.f32.vlgmr.msra.gmra.mrb[4].mxu0 %vm260_vm0, %v2072_v31  ;;  %v1688_v24 = vld [vmem:[%s2487_s2 + $0xe0] sm:$0xff]  ;;  %v1690_v27 = vld [vmem:[%s2487_s2 + $0xf0] sm:$0xff]  ;;  %v1691_v28 = vld [vmem:[%s2487_s2 + $0xf8] sm:$0xff] }
  0x21   : > { %1763 = vmatpush1.bf16.msra.mxu0 %v1762_v0  ;;  %414 = vmatprep.mubr.f32.mxu0 %v1961_v7  ;;  %v1670_v0 = vld [vmem:[%s2487_s2 + $0x90] sm:$0xff] }
  0x22   : > { %1765 = vmatprep.subr.bf16.mxu0 %v1764_v1  ;;  %v1649_v1 = vld [vmem:[%s2487_s2 + $0x68] sm:$0xff] }
  0x24   : > { %1637 = vmatmul.mubr.msk.f32.gmra.mrb[6].mxu0 %vm260_vm0, %v2108_v47 }
  0x25   : > { %1767 = vmatpush1.bf16.msra.mxu0 %v1766_v6  ;;  %485 = vmatprep.mubr.f32.mxu0 %v1961_v7  ;;  %v1650_v6 = vld [vmem:[%s2487_s2 + $0x70] sm:$0xff] }
  0x26   : > { %1769 = vmatprep.subr.bf16.mxu0 %v1768_v8  ;;  %v1672_v8 = vld [vmem:[%s2487_s2 + $0xa0] sm:$0xff] }
  0x29   : > { %1771 = vmatpush1.bf16.msra.mxu0 %v1770_v13  ;;  %v653_v13 = vld [vmem:[%s2487_s2 + $0x8] sm:$0xff] }
  0x2a   : > { %1785 = vmatprep.subr.bf16.mxu0 %v1784_v14  ;;  %v1675_v14 = vld [vmem:[%s2487_s2 + $0xb8] sm:$0xff] }
  0x2c   : > { %1638 = vmatmul.mubr.msk.f32.vlgmr.msra.gmra.mrb[8].mxu0 %vm260_vm0, %v2072_v31 }
  0x2d   : > { %491 = vmatprep.mubr.f32.mxu0 %v1961_v7  ;;  %1787 = vmatpush1.bf16.msra.mxu0 %v1786_v19  ;;  %v656_v19 = vld [vmem:[%s2487_s2 + $0x20] sm:$0xff] }
  0x2e   : > { %1789 = vmatprep.subr.bf16.mxu0 %v1788_v20  ;;  %v1686_v20 = vld [vmem:[%s2487_s2 + $0xd0] sm:$0xff] }
  0x30   : > { %1639 = vmatmul.mubr.msk.f32.gmra.mrb[10].mxu0 %vm260_vm0, %v2108_v47 }
  0x31   : > { %1791 = vmatpush1.bf16.msra.mxu0 %v1790_v25  ;;  %639 = vmatprep.mubr.f32.mxu0 %v1961_v7  ;;  %v659_v25 = vld [vmem:[%s2487_s2 + $0x38] sm:$0xff] }
  0x32   : > { %1793 = vmatprep.subr.bf16.mxu0 %v1792_v26  ;;  %v1689_v26 = vld [vmem:[%s2487_s2 + $0xe8] sm:$0xff] }
  0x35   : > { %1795 = vmatpush1.bf16.msra.mxu0 %v1794_v29  ;;  %v1700_v29 = vld [vmem:[%s2487_s2 + $0x100] sm:$0xff] }
  0x38   : > { %1642 = vmatmul.mubr.msk.f32.vlgmr.msra.gmra.mrb[12].mxu0 %vm260_vm0, %v2072_v31 }
  0x39   : > { %645 = vmatprep.mubr.f32.mxu0 %v1961_v7 }
  0x3c   : > { %1643 = vmatmul.mubr.msk.f32.gmra.mrb[14].mxu0 %vm260_vm0, %v2108_v47 }
  0x3d   : > { %758 = vmatprep.mubr.f32.mxu0 %v1961_v7 }
  0xe7   : > { %v333_v30 = vpop.f32.mrb[0].mxu0 }
  0xe8   : > { %v335_v32 = vpop.f32.mrb[1].mxu0 }
  0xeb   : > { %v339_v33 = vpop.f32.mrb[2].mxu0 }
  0xec   : > { %v1802_v34 = vpack.c.bf16 %v339_v33, %v333_v30  ;;  %v341_v35 = vpop.f32.mrb[3].mxu0  ;;  %v1701_v30 = vld [vmem:[%s2487_s2 + $0x108] sm:$0xff]  ;;  %v1703_v33 = vld [vmem:[%s2487_s2 + $0x118] sm:$0xff] }
  0xed   : > { %v1800_v36 = vpack.c.bf16 %v341_v35, %v335_v32  ;;  %v564_v37 = vpop.f32.mrb[0].mxu1  ;;  %v1702_v32 = vld [vmem:[%s2487_s2 + $0x110] sm:$0xff]  ;;  %v1705_v35 = vld [vmem:[%s2487_s2 + $0x128] sm:$0xff] }
  0xee   : > { %v566_v38 = vpop.f32.mrb[1].mxu1 }
  0xf1   : > { %v570_v41 = vpop.f32.mrb[2].mxu1 }
  0xf2   : > { %v1810_v42 = vpack.c.bf16 %v570_v41, %v564_v37  ;;  %v572_v31 = vpop.f32.mrb[3].mxu1  ;;  %v1707_v37 = vld [vmem:[%s2487_s2 + $0x138] sm:$0xff] }
  0xf3   : > { %v410_v39 = vpop.f32.mrb[4].mxu0  ;;  %v1808_v44 = vpack.c.bf16 %v572_v31, %v566_v38 }
  0xf4   : > { %v412_v40 = vpop.f32.mrb[5].mxu0 }
  0xf7   : > { %v416_v43 = vpop.f32.mrb[6].mxu0 }
  0xf8   : > { %v1798_v45 = vpack.c.bf16 %v416_v43, %v410_v39  ;;  %v418_v46 = vpop.f32.mrb[7].mxu0 }
  0xf9   : > { %v1796_v47 = vpack.c.bf16 %v418_v46, %v412_v40 }
  0xfb   : > { %1797 = vmatprep.subr.bf16.mxu0 %v1796_v47 }
  0xfc   : > { %1799 = vmatpush1.bf16.msra.mxu0 %v1798_v45 }
  0xfd   : > { %1801 = vmatprep.subr.bf16.mxu0 %v1800_v36  ;;  %v1706_v36 = vld [vmem:[%s2487_s2 + $0x130] sm:$0xff] }
  0xff   : > { %v487_v49 = vpop.f32.mrb[8].mxu0  ;;  %1652 = vmatmul.mubr.msk.f32.vlgmr.msra.gmra.mrb[16].mxu0 %vm669_vm1, %v1644_v48 }
 0x100   : > { %v489_v50 = vpop.f32.mrb[9].mxu0  ;;  %1803 = vmatpush1.bf16.msra.mxu0 %v1802_v34  ;;  %764 = vmatprep.mubr.f32.mxu0 %v1961_v7  ;;  %v1704_v34 = vld [vmem:[%s2487_s2 + $0x120] sm:$0xff] }
 0x103   : > { %v493_v52 = vpop.f32.mrb[10].mxu0  ;;  %1653 = vmatmul.mubr.msk.f32.gmra.mrb[18].mxu0 %vm669_vm1, %v1645_v51 }
 0x104   : > { %v1806_v53 = vpack.c.bf16 %v493_v52, %v487_v49  ;;  %v495_v54 = vpop.f32.mrb[11].mxu0  ;;  %770 = vmatprep.mubr.f32.mxu0 %v1961_v7  ;;  %v1432_v52 = vlaneseq }
 0x105   : > { %v1804_v56 = vpack.c.bf16 %v495_v54, %v489_v50 }
 0x107   : > { %1805 = vmatprep.subr.bf16.mxu1 %v1804_v56  ;;  %1654 = vmatmul.mubr.msk.f32.gmra.mrb[20].mxu0 %vm669_vm1, %v1646_v55  ;;  %v1430_v55 = vld [vmem:[%s2488_s3] sm:$0x3] }
 0x108   : > { %1807 = vmatpush1.bf16.msra.mxu1 %v1806_v53  ;;  %776 = vmatprep.mubr.f32.mxu0 %v1961_v7  ;;  %v1433_v53 = vshrl.u32 %v1432_v52, 7 }
 0x109   : > { %1809 = vmatprep.subr.bf16.mxu1 %v1808_v44 }
 0x10a   : > { %v1434_v54 = vsub.s32 0, %v1433_v53  ;;  %v1438_v56 = vsub.s32 1, %v1433_v53 }
 0x10b   : > { %1676 = vmatmul.mubr.msk.f32.vlgmr.msra.gmra.mrb[4].mxu1 %vm669_vm1, %v1668_v57  ;;  %1655 = vmatmul.mubr.msk.f32.gmra.mrb[22].mxu0 %vm669_vm1, %v1647_v58  ;;  %v641_v59 = vpop.f32.mrb[12].mxu0 }
 0x10c   : > { %1811 = vmatpush1.bf16.msra.mxu1 %v1810_v42  ;;  %1047 = vmatprep.mubr.f32.mxu1 %v1961_v7  ;;  %v643_v62 = vpop.f32.mrb[13].mxu0  ;;  %v2434_v57 = vrot.slane %v1430_v55, %v1434_v54 }
 0x10d   : > { %782 = vmatprep.mubr.f32.mxu0 %v1961_v7 }
 0x10f   : > { %1677 = vmatmul.mubr.msk.f32.gmra.mrb[6].mxu1 %vm669_vm1, %v1669_v60  ;;  %1656 = vmatmul.mubr.msk.f32.gmra.mrb[24].mxu0 %vm669_vm1, %v1648_v61  ;;  %v647_v63 = vpop.f32.mrb[14].mxu0 }
 0x110   : > { %1053 = vmatprep.mubr.f32.mxu1 %v1961_v7  ;;  %788 = vmatprep.mubr.f32.mxu0 %v1961_v7  ;;  %v1814_v2 = vpack.c.bf16 %v647_v63, %v641_v59  ;;  %v649_v3 = vpop.f32.mrb[15].mxu0  ;;  %v2436_v59 = vrot.slane %v1430_v55, %v1438_v56 }
 0x111   : > { %v1812_v4 = vpack.c.bf16 %v649_v3, %v643_v62 }
 0x113   : > { %1678 = vmatmul.mubr.msk.f32.gmra.mrb[8].mxu1 %vm669_vm1, %v1670_v0  ;;  %1657 = vmatmul.mubr.msk.f32.gmra.mrb[26].mxu0 %vm669_vm1, %v1649_v1 }
 0x114   : > { %1059 = vmatprep.mubr.f32.mxu1 %v1961_v7  ;;  %794 = vmatprep.mubr.f32.mxu0 %v1961_v7 }
 0x115   : > { %1813 = vmatprep.subr.bf16.mxu1 %v1812_v4 }
 0x117   : > { %1679 = vmatmul.mubr.msk.f32.gmra.mrb[10].mxu1 %vm669_vm1, %v1671_v5  ;;  %1658 = vmatmul.mubr.msk.f32.gmra.mrb[28].mxu0 %vm669_vm1, %v1650_v6 }
 0x118   : > { %1065 = vmatprep.mubr.f32.mxu1 %v1961_v7  ;;  %800 = vmatprep.mubr.f32.mxu0 %v1961_v7 }
 0x11b   : > { %1680 = vmatmul.mubr.msk.f32.gmra.mrb[12].mxu1 %vm669_vm1, %v1672_v8  ;;  %1659 = vmatmul.mubr.msk.f32.gmra.mrb[30].mxu0 %vm669_vm1, %v1651_v9 }
 0x11c   : > { %1071 = vmatprep.mubr.f32.mxu1 %v1961_v7  ;;  %895 = vmatprep.mubr.f32.mxu0 %v1961_v7 }
 0x11f   : > { %1681 = vmatmul.mubr.msk.f32.gmra.mrb[14].mxu1 %vm669_vm1, %v1673_v10  ;;  %1660 = vmatmul.mubr.msk.f32.vlgmr.msra.gmra.mrb[16].mxu0 %vm669_vm1, %v652_v11 }
 0x120   : > { %1077 = vmatprep.mubr.f32.mxu1 %v1961_v7  ;;  %901 = vmatprep.mubr.f32.mxu0 %v1961_v7 }
 0x123   : > { %1682 = vmatmul.mubr.msk.f32.gmra.mrb[16].mxu1 %vm669_vm1, %v1674_v12  ;;  %1661 = vmatmul.mubr.msk.f32.gmra.mrb[18].mxu0 %vm669_vm1, %v653_v13 }
 0x124   : > { %1083 = vmatprep.mubr.f32.mxu1 %v1961_v7  ;;  %907 = vmatprep.mubr.f32.mxu0 %v1961_v7 }
 0x127   : > { %1683 = vmatmul.mubr.msk.f32.gmra.mrb[18].mxu1 %vm669_vm1, %v1675_v14  ;;  %1662 = vmatmul.mubr.msk.f32.gmra.mrb[20].mxu0 %vm669_vm1, %v654_v15 }
 0x128   : > { %1203 = vmatprep.mubr.f32.mxu1 %v1961_v7  ;;  %913 = vmatprep.mubr.f32.mxu0 %v1961_v7 }
 0x12b   : > { %1692 = vmatmul.mubr.msk.f32.vlgmr.msra.gmra.mrb[4].mxu1 %vm669_vm1, %v1684_v16  ;;  %1663 = vmatmul.mubr.msk.f32.gmra.mrb[22].mxu0 %vm669_vm1, %v655_v17 }
 0x12c   : > { %1815 = vmatpush1.bf16.msra.mxu1 %v1814_v2  ;;  %1209 = vmatprep.mubr.f32.mxu1 %v1961_v7 }
 0x12d   : > { %919 = vmatprep.mubr.f32.mxu0 %v1961_v7 }
 0x12f   : > { %1693 = vmatmul.mubr.msk.f32.gmra.mrb[6].mxu1 %vm669_vm1, %v1685_v18  ;;  %1664 = vmatmul.mubr.msk.f32.gmra.mrb[24].mxu0 %vm669_vm1, %v656_v19 }
 0x130   : > { %1215 = vmatprep.mubr.f32.mxu1 %v1961_v7  ;;  %925 = vmatprep.mubr.f32.mxu0 %v1961_v7 }
 0x133   : > { %1694 = vmatmul.mubr.msk.f32.gmra.mrb[8].mxu1 %vm669_vm1, %v1686_v20  ;;  %1665 = vmatmul.mubr.msk.f32.gmra.mrb[26].mxu0 %vm669_vm1, %v657_v21 }
 0x134   : > { %1221 = vmatprep.mubr.f32.mxu1 %v1961_v7  ;;  %931 = vmatprep.mubr.f32.mxu0 %v1961_v7 }
 0x137   : > { %1695 = vmatmul.mubr.msk.f32.gmra.mrb[10].mxu1 %vm669_vm1, %v1687_v22  ;;  %1666 = vmatmul.mubr.msk.f32.gmra.mrb[28].mxu0 %vm669_vm1, %v658_v23 }
 0x138   : > { %1227 = vmatprep.mubr.f32.mxu1 %v1961_v7  ;;  %937 = vmatprep.mubr.f32.mxu0 %v1961_v7 }
 0x13b   : > { %1696 = vmatmul.mubr.msk.f32.gmra.mrb[12].mxu1 %vm669_vm1, %v1688_v24  ;;  %1667 = vmatmul.mubr.msk.f32.gmra.mrb[30].mxu0 %vm669_vm1, %v659_v25 }
 0x13c   : > { %1233 = vmatprep.mubr.f32.mxu1 %v1961_v7 }
 0x13f   : > { %1697 = vmatmul.mubr.msk.f32.gmra.mrb[14].mxu1 %vm669_vm1, %v1689_v26 }
 0x140   : > { %1239 = vmatprep.mubr.f32.mxu1 %v1961_v7 }
 0x143   : > { %1698 = vmatmul.mubr.msk.f32.gmra.mrb[16].mxu1 %vm669_vm1, %v1690_v27 }
 0x144   : > { %1245 = vmatprep.mubr.f32.mxu1 %v1961_v7 }
 0x147   : > { %1699 = vmatmul.mubr.msk.f32.gmra.mrb[18].mxu1 %vm669_vm1, %v1691_v28 }
 0x148   : > { %1365 = vmatprep.mubr.f32.mxu1 %v1961_v7 }
 0x14b   : > { %1708 = vmatmul.mubr.msk.f32.vlgmr.msra.gmra.mrb[4].mxu1 %vm669_vm1, %v1700_v29 }
 0x14c   : > { %1371 = vmatprep.mubr.f32.mxu1 %v1961_v7 }
 0x14f   : > { %1709 = vmatmul.mubr.msk.f32.gmra.mrb[6].mxu1 %vm669_vm1, %v1701_v30 }
 0x150   : > { %1377 = vmatprep.mubr.f32.mxu1 %v1961_v7 }
 0x153   : > { %1710 = vmatmul.mubr.msk.f32.gmra.mrb[8].mxu1 %vm669_vm1, %v1702_v32 }
 0x154   : > { %1383 = vmatprep.mubr.f32.mxu1 %v1961_v7 }
 0x157   : > { %1711 = vmatmul.mubr.msk.f32.gmra.mrb[10].mxu1 %vm669_vm1, %v1703_v33 }
 0x158   : > { %1389 = vmatprep.mubr.f32.mxu1 %v1961_v7 }
 0x15b   : > { %1712 = vmatmul.mubr.msk.f32.gmra.mrb[12].mxu1 %vm669_vm1, %v1704_v34 }
 0x15c   : > { %1395 = vmatprep.mubr.f32.mxu1 %v1961_v7 }
 0x15f   : > { %1713 = vmatmul.mubr.msk.f32.gmra.mrb[14].mxu1 %vm669_vm1, %v1705_v35 }
 0x160   : > { %1401 = vmatprep.mubr.f32.mxu1 %v1961_v7 }
 0x163   : > { %1714 = vmatmul.mubr.msk.f32.gmra.mrb[16].mxu1 %vm669_vm1, %v1706_v36 }
 0x164   : > { %1407 = vmatprep.mubr.f32.mxu1 %v1961_v7 }
 0x167   : > { %1715 = vmatmul.mubr.msk.f32.gmra.mrb[18].mxu1 %vm669_vm1, %v1707_v37 }
 0x1f2   : > { %v897_v38 = vpop.f32.mrb[16].mxu0 }
 0x1f3   : > { %v899_v39 = vpop.f32.mrb[17].mxu0 }
 0x1f6   : > { %v903_v40 = vpop.f32.mrb[18].mxu0 }
 0x1f7   : > { %v905_v41 = vpop.f32.mrb[19].mxu0 }
 0x1fa   : > { %v909_v42 = vpop.f32.mrb[20].mxu0 }
 0x1fb   : > { %v911_v31 = vpop.f32.mrb[21].mxu0 }
 0x1fe   : > { %v915_v43 = vpop.f32.mrb[22].mxu0 }
 0x1ff   : > { %v917_v44 = vpop.f32.mrb[23].mxu0 }
 0x202   : > { %v921_v45 = vpop.f32.mrb[24].mxu0 }
 0x203   : > { %v923_v46 = vpop.f32.mrb[25].mxu0 }
 0x206   : > { %v2419_v47 = vpop.f32.mrb[26].mxu0 }
 0x207   : > { %v2421_v48 = vpop.f32.mrb[27].mxu0 }
 0x20a   : > { %v2423_v7 = vpop.f32.mrb[28].mxu0 }
 0x20b   : > { %v2425_v49 = vpop.f32.mrb[29].mxu0 }
 0x20e   : > { %v2427_v50 = vpop.f32.mrb[30].mxu0 }
 0x20f   : > { %v2429_v51 = vpop.f32.mrb[31].mxu0 }
 0x21e   : > { %v1367_v58 = vpop.f32.mrb[4].mxu1 }
 0x21f   : > { %v1816_v60 = vadd.f32 %v1367_v58, %v897_v38  ;;  %v1369_v61 = vpop.f32.mrb[5].mxu1 }
 0x220   : > { %v1817_v62 = vadd.f32 %v1369_v61, %v899_v39 }
 0x221   : > { %v1442_v63 = vadd.f32 %v1816_v60, %v2434_v57 }
 0x222   : > { %v1443_v0 = vadd.f32 %v1817_v62, %v2436_v59  ;;  %v1373_v1 = vpop.f32.mrb[6].mxu1 }
 0x223   : > { %v1716_v2 = vmul.f32 -1.442695, %v1442_v63  ;;  %v1818_v3 = vadd.f32 %v1373_v1, %v903_v40  ;;  %v1375_v4 = vpop.f32.mrb[7].mxu1 }
 0x224   : > { %v1717_v5 = vmul.f32 -1.442695, %v1443_v0  ;;  %v1819_v6 = vadd.f32 %v1375_v4, %v905_v41 }
 0x225   : > { %1889 = vpow2.f32 %v1716_v2  ;;  %v1444_v8 = vadd.f32 %v1818_v3, %v2434_v57 }
 0x226   : > { %1891 = vpow2.f32 %v1717_v5  ;;  %v1445_v9 = vadd.f32 %v1819_v6, %v2436_v59  ;;  %v1379_v10 = vpop.f32.mrb[8].mxu1 }
 0x227   : > { %v1718_v11 = vmul.f32 -1.442695, %v1444_v8  ;;  %v1820_v12 = vadd.f32 %v1379_v10, %v909_v42  ;;  %v1381_v13 = vpop.f32.mrb[9].mxu1 }
 0x228   : > { %v1719_v14 = vmul.f32 -1.442695, %v1445_v9  ;;  %v1821_v15 = vadd.f32 %v1381_v13, %v911_v31 }
 0x229   : > { %1893 = vpow2.f32 %v1718_v11  ;;  %v1446_v16 = vadd.f32 %v1820_v12, %v2434_v57 }
 0x22a   : > { %1895 = vpow2.f32 %v1719_v14  ;;  %v1447_v17 = vadd.f32 %v1821_v15, %v2436_v59  ;;  %v1385_v18 = vpop.f32.mrb[10].mxu1 }
 0x22b   : > { %v1720_v19 = vmul.f32 -1.442695, %v1446_v16  ;;  %v1822_v20 = vadd.f32 %v1385_v18, %v915_v43  ;;  %v1387_v21 = vpop.f32.mrb[11].mxu1 }
 0x22c   : > { %v1721_v22 = vmul.f32 -1.442695, %v1447_v17  ;;  %v1823_v23 = vadd.f32 %v1387_v21, %v917_v44 }
 0x22d   : > { %1897 = vpow2.f32 %v1720_v19  ;;  %v1448_v24 = vadd.f32 %v1822_v20, %v2434_v57 }
 0x22e   : > { %1899 = vpow2.f32 %v1721_v22  ;;  %v1449_v25 = vadd.f32 %v1823_v23, %v2436_v59  ;;  %v1391_v26 = vpop.f32.mrb[12].mxu1 }
 0x22f   : > { %v1890_v27 = vpop.eup %1889  ;;  %v1722_v28 = vmul.f32 -1.442695, %v1448_v24  ;;  %v1824_v29 = vadd.f32 %v1391_v26, %v921_v45  ;;  %v1393_v30 = vpop.f32.mrb[13].mxu1 }
 0x230   : > { %v1892_v32 = vpop.eup %1891  ;;  %v1506_v33 = vadd.f32 1.0, %v1890_v27  ;;  %v1723_v34 = vmul.f32 -1.442695, %v1449_v25  ;;  %v1825_v35 = vadd.f32 %v1393_v30, %v923_v46 }
 0x231   : > { %v1507_v36 = vadd.f32 1.0, %v1892_v32  ;;  %1901 = vpow2.f32 %v1722_v28  ;;  %v1450_v37 = vadd.f32 %v1824_v29, %v2434_v57 }
 0x232   : > { %1903 = vrcp.f32 %v1506_v33  ;;  %v1451_v38 = vadd.f32 %v1825_v35, %v2436_v59  ;;  %v1397_v39 = vpop.f32.mrb[14].mxu1 }
 0x233   : > { %v1894_v40 = vpop.eup %1893  ;;  %1905 = vrcp.f32 %v1507_v36  ;;  %v1724_v41 = vmul.f32 -1.442695, %v1450_v37  ;;  %v1826_v42 = vadd.f32 %v1397_v39, %v2419_v47  ;;  %v1399_v31 = vpop.f32.mrb[15].mxu1 }
 0x234   : > { %v1896_v43 = vpop.eup %1895  ;;  %v1508_v44 = vadd.f32 1.0, %v1894_v40  ;;  %1907 = vpow2.f32 %v1723_v34  ;;  %v1725_v45 = vmul.f32 -1.442695, %v1451_v38  ;;  %v1827_v46 = vadd.f32 %v1399_v31, %v2421_v48 }
 0x235   : > { %v1509_v52 = vadd.f32 1.0, %v1896_v43  ;;  %1909 = vpow2.f32 %v1724_v41  ;;  %v1452_v53 = vadd.f32 %v1826_v42, %v2434_v57 }
 0x236   : > { %1911 = vrcp.f32 %v1508_v44  ;;  %v1453_v54 = vadd.f32 %v1827_v46, %v2436_v59  ;;  %v1403_v55 = vpop.f32.mrb[16].mxu1 }
 0x237   : > { %v1898_v56 = vpop.eup %1897  ;;  %1913 = vrcp.f32 %v1509_v52  ;;  %v1726_v58 = vmul.f32 -1.442695, %v1452_v53  ;;  %v1828_v47 = vadd.f32 %v1403_v55, %v2423_v7  ;;  %v1405_v60 = vpop.f32.mrb[17].mxu1 }
 0x238   : > { %v1900_v61 = vpop.eup %1899  ;;  %v1510_v62 = vadd.f32 1.0, %v1898_v56  ;;  %1915 = vpow2.f32 %v1725_v45  ;;  %v1727_v63 = vmul.f32 -1.442695, %v1453_v54  ;;  %v1829_v48 = vadd.f32 %v1405_v60, %v2425_v49 }
 0x239   : > { %v1511_v0 = vadd.f32 1.0, %v1900_v61  ;;  %1917 = vpow2.f32 %v1726_v58  ;;  %v1454_v1 = vadd.f32 %v1828_v47, %v2434_v57 }
 0x23a   : > { %1919 = vrcp.f32 %v1510_v62  ;;  %v1455_v7 = vadd.f32 %v1829_v48, %v2436_v59  ;;  %v1409_v2 = vpop.f32.mrb[18].mxu1 }
 0x23b   : > { %v1902_v3 = vpop.eup %1901  ;;  %1921 = vrcp.f32 %v1511_v0  ;;  %v1728_v4 = vmul.f32 -1.442695, %v1454_v1  ;;  %v1830_v49 = vadd.f32 %v1409_v2, %v2427_v50  ;;  %v1411_v5 = vpop.f32.mrb[19].mxu1 }
 0x23c   : > { %v1904_v6 = vpop.eup %1903  ;;  %v1512_v8 = vadd.f32 1.0, %v1902_v3  ;;  %1923 = vpow2.f32 %v1727_v63  ;;  %v1729_v9 = vmul.f32 -1.442695, %v1455_v7  ;;  %v1831_v10 = vadd.f32 %v1411_v5, %v2429_v51 }
 0x23d   : > { %v1906_v11 = vpop.eup %1905  ;;  %1554 = vst [vmem:[%s2459_s9] sm:$0xff] %v1904_v6  ;;  %1925 = vpow2.f32 %v1728_v4  ;;  %v1456_v12 = vadd.f32 %v1830_v49, %v2434_v57 }
 0x23e   : > { %v1908_v13 = vpop.eup %1907  ;;  %1555 = vst [vmem:[%s2459_s9 + $0x8] sm:$0xff] %v1906_v11  ;;  %1927 = vrcp.f32 %v1512_v8  ;;  %v1457_v14 = vadd.f32 %v1831_v10, %v2436_v59 }
 0x23f   : > { %v1910_v50 = vpop.eup %1909  ;;  %v1513_v15 = vadd.f32 1.0, %v1908_v13  ;;  %1929 = vpow2.f32 %v1729_v9  ;;  %v1730_v16 = vmul.f32 -1.442695, %v1456_v12 }
 0x240   : > { %v1912_v17 = vpop.eup %1911  ;;  %v1514_v18 = vadd.f32 1.0, %v1910_v50  ;;  %v1731_v51 = vmul.f32 -1.442695, %v1457_v14 }
 0x241   : > { %v1914_v19 = vpop.eup %1913  ;;  %1556 = vst [vmem:[%s2459_s9 + $0x10] sm:$0xff] %v1912_v17  ;;  %1931 = vrcp.f32 %v1513_v15 }
 0x242   : > { %v1916_v20 = vpop.eup %1915  ;;  %1557 = vst [vmem:[%s2459_s9 + $0x18] sm:$0xff] %v1914_v19  ;;  %1933 = vrcp.f32 %v1514_v18 }
 0x243   : > { %v1918_v57 = vpop.eup %1917  ;;  %v1515_v21 = vadd.f32 1.0, %v1916_v20  ;;  %1935 = vpow2.f32 %v1730_v16 }
 0x244   : > { %v1920_v59 = vpop.eup %1919  ;;  %v1516_v22 = vadd.f32 1.0, %v1918_v57  ;;  %1937 = vpow2.f32 %v1731_v51 }
 0x245   : > { %v1922_v23 = vpop.eup %1921  ;;  %1558 = vst [vmem:[%s2459_s9 + $0x20] sm:$0xff] %v1920_v59  ;;  %1939 = vrcp.f32 %v1515_v21 }
 0x246   : > { %v1924_v24 = vpop.eup %1923  ;;  %1559 = vst [vmem:[%s2459_s9 + $0x28] sm:$0xff] %v1922_v23  ;;  %1941 = vrcp.f32 %v1516_v22 }
 0x247   : > { %v1926_v25 = vpop.eup %1925  ;;  %v1517_v26 = vadd.f32 1.0, %v1924_v24 }
 0x248   : > { %v1928_v27 = vpop.eup %1927  ;;  %v1518_v28 = vadd.f32 1.0, %v1926_v25 }
 0x249   : > { %v1930_v29 = vpop.eup %1929  ;;  %1560 = vst [vmem:[%s2459_s9 + $0x30] sm:$0xff] %v1928_v27  ;;  %1943 = vrcp.f32 %v1517_v26 }
 0x24a   : > { %1945 = vrcp.f32 %v1518_v28  ;;  %v1519_v30 = vadd.f32 1.0, %v1930_v29 }
 0x24b   : > { %v1932_v32 = vpop.eup %1931 }
 0x24c   : > { %v1934_v33 = vpop.eup %1933  ;;  %1561 = vst [vmem:[%s2459_s9 + $0x38] sm:$0xff] %v1932_v32  ;;  %1947 = vrcp.f32 %v1519_v30 }
 0x24d   : > { %v1936_v34 = vpop.eup %1935  ;;  %1562 = vst [vmem:[%s2459_s9 + $0x40] sm:$0xff] %v1934_v33 }
 0x24e   : > { %v1938_v35 = vpop.eup %1937  ;;  %v1520_v36 = vadd.f32 1.0, %v1936_v34 }
 0x24f   : > { %v1940_v37 = vpop.eup %1939  ;;  %v1521_v38 = vadd.f32 1.0, %v1938_v35 }
 0x250   : > { %v1942_v39 = vpop.eup %1941  ;;  %1563 = vst [vmem:[%s2459_s9 + $0x48] sm:$0xff] %v1940_v37  ;;  %1949 = vrcp.f32 %v1520_v36 }
 0x251   : > { %1564 = vst [vmem:[%s2459_s9 + $0x50] sm:$0xff] %v1942_v39  ;;  %1951 = vrcp.f32 %v1521_v38 }
 0x253   : > { %v1944_v40 = vpop.eup %1943 }
 0x254   : > { %v1946_v41 = vpop.eup %1945  ;;  %1565 = vst [vmem:[%s2459_s9 + $0x58] sm:$0xff] %v1944_v40 }
 0x255   : > { %1566 = vst [vmem:[%s2459_s9 + $0x60] sm:$0xff] %v1946_v41 }
 0x256   : > { %v1948_v42 = vpop.eup %1947 }
 0x257   : > { %1567 = vst [vmem:[%s2459_s9 + $0x68] sm:$0xff] %v1948_v42 }
 0x25a   : > { %v1950_v31 = vpop.eup %1949 }
 0x25b   : > { %v1952_v43 = vpop.eup %1951  ;;  %1568 = vst [vmem:[%s2459_s9 + $0x70] sm:$0xff] %v1950_v31 }
 0x25c   : > { %1569 = vst [vmem:[%s2459_s9 + $0x78] sm:$0xff] %v1952_v43 }
 0x25d PF: > { %s14_s15 = sadd.s32 1, %s1959_s15  }
 0x25e   : > { %p11_p4 = scmp.ge.s32.totalorder %s14_s15, 4  }
 0x260   :  { %13 = sbr.rel (!%p11_p4) target bundleno = 1 (0x1), region = 70 }

</bundles_post_ra>
